<compile_context>
chip_gen: v7x
topology: tpu7x:2x2x1
jax: 0.10.0
libtpu: 0.0.40
codegen_flags: <defaults>
</compile_context>

<pallas_src>
import functools

import jax
import jax.numpy as jnp
from jax import lax
from jax.experimental import pallas as pl
from jax.experimental.pallas import tpu as pltpu


def _attn_kernel_nomask(q_ref, k_ref, v_ref, out_ref, save_ref, attn_ref, *,
                        inv_temperature):
    # Blocks: q (1, TQ, D), k (1, Lk, D), v (1, Lk, Dv), outputs (1, TQ, *).
    q = q_ref[0] * inv_temperature                 # (TQ, D), native dtype
    k = k_ref[0]                                   # (Lk, D)
    v = v_ref[0]                                   # (Lk, Dv)

    # energies = (q / temperature) @ k^T  -- contract last dims, no transpose.
    e = lax.dot_general(q, k, dimension_numbers=(((1,), (1,)), ((), ())),
                        preferred_element_type=jnp.float32)   # (TQ, Lk) f32

    # mask is None -> save = raw (scaled) energies
    save_ref[0] = e.astype(save_ref.dtype)

    m = jnp.max(e, axis=-1, keepdims=True)
    p = jnp.exp(e - m)
    attn = p * pl.reciprocal(jnp.sum(p, axis=-1, keepdims=True), approx=False)
    attn_ref[0] = attn.astype(attn_ref.dtype)

    out_ref[0] = jnp.dot(attn.astype(v.dtype), v,
                         preferred_element_type=jnp.float32).astype(out_ref.dtype)


def _attn_kernel_masked(q_ref, k_ref, v_ref, mask_ref, out_ref, save_ref,
                        attn_ref, *, inv_temperature):
    q = q_ref[0] * inv_temperature                 # (TQ, D)
    k = k_ref[0]                                   # (Lk, D)
    v = v_ref[0]                                   # (Lk, Dv)
    masked = mask_ref[0] != 0                      # (TQ, Lk) bool, nonzero == masked

    e = lax.dot_general(q, k, dimension_numbers=(((1,), (1,)), ((), ())),
                        preferred_element_type=jnp.float32)   # (TQ, Lk) f32

    # Single exp pass shared between the two softmaxes (unmasked row max >=
    # masked row max, so this is mathematically exact).
    m = jnp.max(e, axis=-1, keepdims=True)
    p = jnp.exp(e - m)

    # mask is not None -> save = softmax(raw energies)
    save = p * pl.reciprocal(jnp.sum(p, axis=-1, keepdims=True), approx=False)
    save_ref[0] = save.astype(save_ref.dtype)

    # masked_fill(-inf) + softmax == zero masked probabilities, renormalize.
    p_m = jnp.where(masked, 0.0, p)
    attn = p_m * pl.reciprocal(jnp.sum(p_m, axis=-1, keepdims=True), approx=False)
    attn_ref[0] = attn.astype(attn_ref.dtype)

    out_ref[0] = jnp.dot(attn.astype(v.dtype), v,
                         preferred_element_type=jnp.float32).astype(out_ref.dtype)


def _pick_tq(Lq, Lk, D, Dv, has_mask, bytes_budget=24 * 1024 * 1024):
    """Largest Lq-tile whose double-buffered VMEM footprint fits the budget."""
    tq = min(Lq, 512)
    while tq > 8:
        per_step = (
            2 * 4 * (tq * D + Lk * D + Lk * Dv)      # q/k/v input blocks (f32 worst case)
            + (2 * 1 * tq * Lk if has_mask else 0)   # int8 mask block
            + 2 * 4 * 2 * (tq * Lk)                  # save + attn output blocks
            + 2 * 4 * (tq * Dv)                      # output block
        )
        if per_step <= bytes_budget:
            break
        tq //= 2
    return max(min(Lq, 8), tq)


def topk_scaled_dot_product_attention(q, k, v, temperature, mask=None, *, tq=None):
    """Pallas implementation of TopK_ScaledDotProductAttention.forward."""
    B, Lq, D = q.shape
    _, Lk, Dk = k.shape
    _, _, Dv = v.shape
    assert Dk == D and k.shape[0] == B and v.shape[0] == B and v.shape[1] == Lk

    if tq is None:
        tq = _pick_tq(Lq, Lk, D, Dv, mask is not None)
    tq = min(tq, Lq)
    grid = (B, pl.cdiv(Lq, tq))

    out_shapes = (
        jax.ShapeDtypeStruct((B, Lq, Dv), jnp.float32),  # output
        jax.ShapeDtypeStruct((B, Lq, Lk), jnp.float32),  # save
        jax.ShapeDtypeStruct((B, Lq, Lk), jnp.float32),  # attn
    )

    spec_q = pl.BlockSpec((1, tq, D), lambda b, i: (b, i, 0))
    # K/V block index is constant along the Lq axis -> stays resident in VMEM.
    spec_k = pl.BlockSpec((1, Lk, D), lambda b, i: (b, 0, 0))
    spec_v = pl.BlockSpec((1, Lk, Dv), lambda b, i: (b, 0, 0))
    spec_scores = pl.BlockSpec((1, tq, Lk), lambda b, i: (b, i, 0))
    spec_o = pl.BlockSpec((1, tq, Dv), lambda b, i: (b, i, 0))

    inv_t = 1.0 / float(temperature)
    if mask is None:
        kernel = functools.partial(_attn_kernel_nomask, inv_temperature=inv_t)
        in_specs = [spec_q, spec_k, spec_v]
        args = (q, k, v)
    else:
        kernel = functools.partial(_attn_kernel_masked, inv_temperature=inv_t)
        in_specs = [spec_q, spec_k, spec_v, spec_scores]
        args = (q, k, v, mask.astype(jnp.int8))   # int8: 4x fewer DMA bytes than int32

    return pl.pallas_call(
        kernel,
        out_shape=out_shapes,
        grid_spec=pltpu.PrefetchScalarGridSpec(
            num_scalar_prefetch=0,
            grid=grid,
            in_specs=in_specs,
            out_specs=[spec_o, spec_scores, spec_scores],
        ),
        compiler_params=pltpu.CompilerParams(
            dimension_semantics=("parallel", "parallel"),
            vmem_limit_bytes=32 * 1024 * 1024),
    )(*args)


def _reference(q, k, v, temperature, mask=None):
    e = jnp.einsum("bqd,bkd->bqk", q, k) / temperature
    save = e
    if mask is not None:
        save = jax.nn.softmax(save, axis=2)
        e = jnp.where(mask, -jnp.inf, e)
    attn = jax.nn.softmax(e, axis=2)
    out = jnp.einsum("bqk,bkd->bqd", attn, v)
    return out, save, attn


def _check(name, got, ref, atol=1e-4, rtol=1e-4):
    for g, r, what in zip(got, ref, ("output", "save", "attn")):
        assert jnp.allclose(g, r, atol=atol, rtol=rtol), f"{name}: {what} mismatch"


if __name__ == "__main__":
    key = jax.random.PRNGKey(0)
    kq, kk, kv, km, kq2, kk2, kv2, km2 = jax.random.split(key, 8)

    # --- small shape, no mask -------------------------------------------------
    B, Lq, Lk, D, Dv = 2, 8, 8, 32, 32
    temperature = float(D) ** 0.5
    q = jax.random.normal(kq, (B, Lq, D), dtype=jnp.float32)
    k = jax.random.normal(kk, (B, Lk, D), dtype=jnp.float32)
    v = jax.random.normal(kv, (B, Lk, Dv), dtype=jnp.float32)

    res = topk_scaled_dot_product_attention(q, k, v, temperature)
    jax.block_until_ready(res)
    _check("nomask", res, _reference(q, k, v, temperature))

    # --- small shape, with mask ----------------------------------------------
    mask = jax.random.uniform(km, (B, Lq, Lk)) < 0.3
    mask = mask.at[:, :, 0].set(False)   # keep every row partially unmasked (no NaN rows)
    res = topk_scaled_dot_product_attention(q, k, v, temperature, mask)
    jax.block_until_ready(res)
    _check("masked", res, _reference(q, k, v, temperature, mask))

    # --- larger shape exercising the Lq-tiled grid (grid = (B, 2)) ------------
    B2, Lq2, Lk2, D2, Dv2 = 2, 256, 128, 64, 128
    temperature2 = float(D2) ** 0.5
    q2 = jax.random.normal(kq2, (B2, Lq2, D2), dtype=jnp.float32)
    k2 = jax.random.normal(kk2, (B2, Lk2, D2), dtype=jnp.float32)
    v2 = jax.random.normal(kv2, (B2, Lk2, Dv2), dtype=jnp.float32)
    mask2 = jax.random.uniform(km2, (B2, Lq2, Lk2)) < 0.25
    mask2 = mask2.at[:, :, 0].set(False)

    res2 = topk_scaled_dot_product_attention(q2, k2, v2, temperature2, mask2, tq=128)
    jax.block_until_ready(res2)
    _check("tiled-masked", res2, _reference(q2, k2, v2, temperature2, mask2))

    print("KERNEL_OK")
</pallas_src>

<mosaic_0001>
module attributes {stable_mosaic.version = 11 : i64} {
  func.func @_attn_kernel_nomask(%arg0: i32, %arg1: i32, %arg2: memref<1x8x32xf32, #tpu.memory_space<vmem>>, %arg3: memref<1x8x32xf32, #tpu.memory_space<vmem>>, %arg4: memref<1x8x32xf32, #tpu.memory_space<vmem>>, %arg5: memref<1x8x32xf32, #tpu.memory_space<vmem>>, %arg6: memref<1x8x8xf32, #tpu.memory_space<vmem>>, %arg7: memref<1x8x8xf32, #tpu.memory_space<vmem>>) attributes {dimension_semantics = [#tpu.dimension_semantics<parallel>, #tpu.dimension_semantics<parallel>], iteration_bounds = array<i64: 2, 1>, scalar_prefetch = 0 : i64, scratch_operands = 0 : i64, tpu.core_type = #tpu.core_type<tc>, window_params = [{transform_indices = @transform_0, window_bounds = array<i64: 1, 8, 32>}, {transform_indices = @transform_1, window_bounds = array<i64: 1, 8, 32>}, {transform_indices = @transform_2, window_bounds = array<i64: 1, 8, 32>}, {transform_indices = @transform_3, window_bounds = array<i64: 1, 8, 32>}, {transform_indices = @transform_4, window_bounds = array<i64: 1, 8, 8>}, {transform_indices = @transform_5, window_bounds = array<i64: 1, 8, 8>}]} {
    %c0 = arith.constant 0 : index
    %c0_0 = arith.constant 0 : index
    %c0_1 = arith.constant 0 : index
    %0 = vector.load %arg2[%c0, %c0_0, %c0_1] : memref<1x8x32xf32, #tpu.memory_space<vmem>>, vector<1x8x32xf32>
    %1 = vector.shape_cast %0 : vector<1x8x32xf32> to vector<8x32xf32>
    %cst = arith.constant 0.176776692 : f32
    %2 = vector.broadcast %cst : f32 to vector<8x32xf32>
    %3 = arith.mulf %1, %2 : vector<8x32xf32>
    %c0_2 = arith.constant 0 : index
    %c0_3 = arith.constant 0 : index
    %c0_4 = arith.constant 0 : index
    %4 = vector.load %arg3[%c0_2, %c0_3, %c0_4] : memref<1x8x32xf32, #tpu.memory_space<vmem>>, vector<1x8x32xf32>
    %5 = vector.shape_cast %4 : vector<1x8x32xf32> to vector<8x32xf32>
    %c0_5 = arith.constant 0 : index
    %c0_6 = arith.constant 0 : index
    %c0_7 = arith.constant 0 : index
    %6 = vector.load %arg4[%c0_5, %c0_6, %c0_7] : memref<1x8x32xf32, #tpu.memory_space<vmem>>, vector<1x8x32xf32>
    %7 = vector.shape_cast %6 : vector<1x8x32xf32> to vector<8x32xf32>
    %cst_8 = arith.constant dense<0.000000e+00> : vector<8x8xf32>
    %8 = tpu.matmul %3, %5, %cst_8 {dimension_numbers = #tpu.dot_dimension_numbers<[1], [1], [0], [0], [0, 0, 1, 0], [], []>} : vector<8x32xf32>, vector<8x32xf32>, vector<8x8xf32> -> vector<8x8xf32>
    %c0_9 = arith.constant 0 : index
    %c0_10 = arith.constant 0 : index
    %c0_11 = arith.constant 0 : index
    %9 = vector.load %arg6[%c0_9, %c0_10, %c0_11] : memref<1x8x8xf32, #tpu.memory_space<vmem>>, vector<1x8x8xf32>
    %10 = vector.shape_cast %9 : vector<1x8x8xf32> to vector<8x8xf32>
    %11 = vector.shape_cast %8 : vector<8x8xf32> to vector<1x8x8xf32>
    tpu.vector_store %arg6[%c0_9, %c0_10, %c0_11], %11 {strides = array<i32>} : memref<1x8x8xf32, #tpu.memory_space<vmem>>, vector<1x8x8xf32>,
    %cst_12 = arith.constant dense<0xFF800000> : vector<8xf32>
    %12 = vector.multi_reduction <maximumf>, %8, %cst_12 [1] : vector<8x8xf32> to vector<8xf32>
    %13 = vector.shape_cast %12 : vector<8xf32> to vector<8x1xf32>
    %14 = vector.broadcast %13 : vector<8x1xf32> to vector<8x8xf32>
    %15 = arith.subf %8, %14 : vector<8x8xf32>
    %16 = math.exp %15 : vector<8x8xf32>
    %cst_13 = arith.constant dense<0.000000e+00> : vector<8xf32>
    %17 = vector.multi_reduction <add>, %16, %cst_13 [1] : vector<8x8xf32> to vector<8xf32>
    %18 = vector.shape_cast %17 : vector<8xf32> to vector<8x1xf32>
    %19 = tpu.reciprocal %18 : vector<8x1xf32> -> vector<8x1xf32>
    %20 = vector.broadcast %19 : vector<8x1xf32> to vector<8x8xf32>
    %21 = arith.mulf %16, %20 : vector<8x8xf32>
    %c0_14 = arith.constant 0 : index
    %c0_15 = arith.constant 0 : index
    %c0_16 = arith.constant 0 : index
    %22 = vector.load %arg7[%c0_14, %c0_15, %c0_16] : memref<1x8x8xf32, #tpu.memory_space<vmem>>, vector<1x8x8xf32>
    %23 = vector.shape_cast %22 : vector<1x8x8xf32> to vector<8x8xf32>
    %24 = vector.shape_cast %21 : vector<8x8xf32> to vector<1x8x8xf32>
    tpu.vector_store %arg7[%c0_14, %c0_15, %c0_16], %24 {strides = array<i32>} : memref<1x8x8xf32, #tpu.memory_space<vmem>>, vector<1x8x8xf32>,
    %cst_17 = arith.constant dense<0.000000e+00> : vector<8x32xf32>
    %25 = tpu.matmul %21, %7, %cst_17 {dimension_numbers = #tpu.dot_dimension_numbers<[1], [0], [0], [1], [0, 0, 1, 1], [], []>} : vector<8x8xf32>, vector<8x32xf32>, vector<8x32xf32> -> vector<8x32xf32>
    %c0_18 = arith.constant 0 : index
    %c0_19 = arith.constant 0 : index
    %c0_20 = arith.constant 0 : index
    %26 = vector.load %arg5[%c0_18, %c0_19, %c0_20] : memref<1x8x32xf32, #tpu.memory_space<vmem>>, vector<1x8x32xf32>
    %27 = vector.shape_cast %26 : vector<1x8x32xf32> to vector<8x32xf32>
    %28 = vector.shape_cast %25 : vector<8x32xf32> to vector<1x8x32xf32>
    tpu.vector_store %arg5[%c0_18, %c0_19, %c0_20], %28 {strides = array<i32>} : memref<1x8x32xf32, #tpu.memory_space<vmem>>, vector<1x8x32xf32>,
    return
  }
  func.func @transform_0(%arg0: i32, %arg1: i32) -> (i32, i32, i32) {
    %c0_i32 = arith.constant 0 : i32
    %c0_i32_0 = arith.constant 0 : i32
    return %arg0, %arg1, %c0_i32 : i32, i32, i32
  }
  func.func @transform_1(%arg0: i32, %arg1: i32) -> (i32, i32, i32) {
    %c0_i32 = arith.constant 0 : i32
    %c0_i32_0 = arith.constant 0 : i32
    %c0_i32_1 = arith.constant 0 : i32
    return %arg0, %c0_i32, %c0_i32_0 : i32, i32, i32
  }
  func.func @transform_2(%arg0: i32, %arg1: i32) -> (i32, i32, i32) {
    %c0_i32 = arith.constant 0 : i32
    %c0_i32_0 = arith.constant 0 : i32
    %c0_i32_1 = arith.constant 0 : i32
    return %arg0, %c0_i32, %c0_i32_0 : i32, i32, i32
  }
  func.func @transform_3(%arg0: i32, %arg1: i32) -> (i32, i32, i32) {
    %c0_i32 = arith.constant 0 : i32
    %c0_i32_0 = arith.constant 0 : i32
    return %arg0, %arg1, %c0_i32 : i32, i32, i32
  }
  func.func @transform_4(%arg0: i32, %arg1: i32) -> (i32, i32, i32) {
    %c0_i32 = arith.constant 0 : i32
    %c0_i32_0 = arith.constant 0 : i32
    return %arg0, %arg1, %c0_i32 : i32, i32, i32
  }
  func.func @transform_5(%arg0: i32, %arg1: i32) -> (i32, i32, i32) {
    %c0_i32 = arith.constant 0 : i32
    %c0_i32_0 = arith.constant 0 : i32
    return %arg0, %arg1, %c0_i32 : i32, i32, i32
  }
}

</mosaic_0001>

<bundles_post_ra>
// kernel: tpu_custom_call.1
= control target key start
LH: loop header
LB: loop body
LE: loop exit
PB: predicated region body
PF: predicated region fallthrough
CT: control target
= control target key end

     0   :  { %s1503_s0 = inlined_call_operand.hbm [shape: f32[2,8,32], index: 0, kind: input, shape index: {}]   ;;  %s1504_s1 = inlined_call_operand.hbm [shape: f32[2,8,32], index: 1, kind: input, shape index: {}]   ;;  %s1505_s2 = inlined_call_operand.hbm [shape: f32[2,8,32], index: 2, kind: input, shape index: {}]   ;;  %s1506_s3 = inlined_call_operand.hbm [shape: f32[2,8,32], index: 3, kind: output, shape index: {0}]   ;;  %s1507_s4 = inlined_call_operand.hbm [shape: f32[2,8,8], index: 4, kind: output, shape index: {1}]   ;;  %s1508_s5 = inlined_call_operand.hbm [shape: f32[2,8,8], index: 5, kind: output, shape index: {2}]  }
   0x1   :  { %1519 = sst [smem:[#allocation21_spill]] %s1504_s1 }
   0x2   :  { %11 = vsyncpa [#allocation3], 0 }
   0x3   :  { %13 = vsyncpa [#allocation3 + $0x1], 0 }
   0x4   :  { %14 = vsyncpa [#allocation6], 0 }
   0x5   :  { %16 = vsyncpa [#allocation6 + $0x1], 0 }
   0x6   :  { %17 = vsyncpa [#allocation4], 0 }
   0x7   :  { %19 = vsyncpa [#allocation4 + $0x1], 0 }
   0x8   :  { %20 = vsyncpa [#allocation10], 0 }
   0x9   :  { %22 = vsyncpa [#allocation10 + $0x1], 0  ;;  %s1164_s18 = smov 0   ;;  %s1166_s19 = smov 0  }
   0xa   :  { %s1168_s20 = smov 0   ;;  %s1170_s21 = smov 0  }
   0xb   :  { %s1172_s22 = smov 0   ;;  %s1174_s23 = smov 0  }
   0xc LB: > { %1520 = sst [smem:[#allocation16_spill]] %s1120_s22  ;;  %s1195_s24 = sadd.s32 4294967295, %s1124_s23   ;;  %s1124_s23 = sphi %s1174_s23, %s28_s23   ;;  %s1120_s22 = sphi %s1172_s22, %s1547_s22   ;;  %s1116_s21 = sphi %s1170_s21, %s1546_s21   ;;  %s1112_s20 = sphi %s1168_s20, %s1550_s20   ;;  %s1108_s19 = sphi %s1166_s19, %s1549_s19   ;;  %s1104_s18 = sphi %s1164_s18, %s1548_s18  }
   0xd   : > { %1521 = sst [smem:[#allocation17_spill]] %s1124_s23  ;;  %s1509_s25 = sadd.s32 4294967294, %s1124_s23  }
   0xe   : > { %s40_s26 = sadd.s32 1, %s1120_s22  ;;  %s49_s27 = sadd.s32 1, %s1112_s20 }
   0xf   : > { %p42_p0 = scmp.ge.s32.totalorder %s40_s26, 2  ;;  %p56_p1 = scmp.ne.s32.totalorder %s1112_s20, %s1108_s19 }
  0x10   : > { %p57_p2 = scmp.eq.s32.totalorder %s1124_s23, 0  ;;  %p62_p3 = scmp.ne.s32.totalorder %s1108_s19, %s1104_s18 }
  0x11   : > { %s1552_s26 = smov (%p42_p0, %s40_s26), 0  ;;  %p63_p5 = scmp.eq.s32.totalorder %s1195_s24, 0 }
  0x12   : > { %1522 = sst [smem:[#allocation18_spill]] %s1552_s26  ;;  %p1207_p4 = por %p57_p2, %p56_p1 }
  0x13   : > { %s44_s29 = ssub.s32 %s1120_s22, %s1552_s26  ;;  %p140_p6 = scmp.eq.s32.totalorder %s1195_s24, 1 }
  0x14   : > { %p47_p7 = scmp.eq.s32.totalorder %s44_s29, 0  ;;  %p1215_p8 = por %p63_p5, %p62_p3 }
  0x15   : > { %p1219_p9 = por %p140_p6, %p56_p1  ;;  %p146_p10 = scmp.eq.s32.totalorder %s1509_s25, 1 }
  0x16   : > { %s1524_s30 = scalar_select %p1215_p8, 1, 0 }
  0x17   : > { %s1525_s6 = scalar_select %p1219_p9, 1, 0 }
  0x18   : > { %s1226_s7 = scalar_select %p47_p7, %s1112_s20, %s49_s27  }
  0x19   : > { %p1228_p11 = por %p146_p10, %p62_p3  ;;  %p832_p13 = scmp.lt.s32.totalorder %s1124_s23, 2 }
  0x1a   : > { %1526 = sst [smem:[#allocation19_spill]] %s1226_s7  ;;  %s1510_s9 = sand.u32 1, %s1112_s20  }
  0x1b   : > { %s1527_s8 = scalar_select %p1228_p11, 1, 0 }
  0x1c   : > { %s1237_s10 = sshll.u32 %s1510_s9, 3  ;;  %s1240_s11 = sshll.u32 %s1120_s22, 7 }
  0x1d   : > { %1528 = sst [smem:[#allocation20_spill]] %s1527_s8  ;;  %p1244_p0 = pnand %p832_p13, %p1207_p4 }
  0x1e   : > { %s241_s13 = sand.u32 1, %s1124_s23   ;;  %s1530_s1 = sld [smem:[#allocation21_spill]] }
  0x1f   : > { %s1529_s12 = scalar_select %p1244_p0, 1, 0 }
  0x20   : > { %s245_s17 = scalar_lea.vmem [#allocation5], %s1237_s10  ;;  %s1260_s28 = scalar_lea.sflag [#allocation6], %s241_s13 }
  0x21   : > { %s252_s27 = sshll.u32 %s245_s17, 4  ;;  %p1266_p4 = pneg %p1244_p0  ;;  %s1257_s27 = int_to_ptr.vmem [resolvable:$true] %s252_s27 }
  0x24   : > { %s1253_s16 = scalar_lea.hbm %s1530_s1, %s1240_s11  ;;  %s893_s17 = scalar_lea.hbm %s1530_s1, 256 }
  0x25   : > { %s888_s29 = scalar_lea.hbm %s1253_s16, 128  ;;  %p894_p7 = scmp.lt.u32.totalorder %s1253_s16, %s1530_s1 }
  0x26   : > { %p889_p3 = scmp.ne.s32.totalorder %s1253_s16, %s888_s29  ;;  %p895_p10 = scmp.lt.u32.totalorder %s893_s17, %s888_s29 }
  0x27   : > { %p897_p12 = scmp.lt.u32.totalorder %s888_s29, %s1253_s16 }
  0x28   : > { %p891_p5 = pnand %p1266_p4, %p889_p3  ;;  %p896_p13 = por %p895_p10, %p894_p7 }
  0x2a   : > { %p892_p6 = pneg %p891_p5  ;;  %p898_p1 = por %p897_p12, %p896_p13 }
  0x2c   : > { %p899_p2 = pnand %p898_p1, %p892_p6 }
  0x2e   : > { %902 = shalt.err (!%p899_p2)
}
  0x2f   : > { %s903_s13 = scalar_lea.vmem %s1257_s27, 128  ;;  %s1126_s14 = smov [#allocation5]  }
  0x30   : > { %p904_p3 = scmp.ne.s32.totalorder %s1257_s27, %s903_s13  ;;  %s908_s15 = sshll.u32 %s1126_s14, 4  ;;  %s909_s15 = int_to_ptr.vmem [resolvable:$false] %s908_s15 }
  0x31   : > { %s910_s26 = scalar_lea.vmem %s909_s15, 256  ;;  %p911_p9 = scmp.lt.s32.totalorder %s1257_s27, %s909_s15 }
  0x32   : > { %p906_p5 = pnand %p904_p3, %p1266_p4  ;;  %p912_p8 = scmp.lt.s32.totalorder %s910_s26, %s903_s13 }
  0x34   : > { %p907_p11 = pneg %p906_p5  ;;  %p913_p7 = por %p912_p8, %p911_p9 }
  0x36   : > { %p914_p10 = pnand %p913_p7, %p907_p11 }
  0x38   : > { %917 = shalt.err (!%p914_p10)
}
  0x39   : > { %818 = dma.hbm_to_vmem [thread:$0]  (!%p1244_p0), %s1253_s16, 128, %s1257_s27, %s1260_s28  }
  0x3a   : > { %p1532_p12 = scmp.lt.s32.totalorder %s1124_s23, 3  ;;  %p1533_p1 = scmp.ge.s32.totalorder %s1124_s23, 1 }
  0x3b   : > { %s1302_s13 = scalar_lea.hbm %s1503_s0, %s1240_s11  ;;  %s226_s14 = scalar_lea.vmem [#allocation2], %s1237_s10 }
  0x3c   : > { %p1294_p2 = pnand %p1533_p1, %p1532_p12  ;;  %s234_s15 = sshll.u32 %s226_s14, 4  ;;  %s1305_s15 = int_to_ptr.vmem [resolvable:$true] %s234_s15 }
  0x3d   : > { %s1311_s26 = scalar_lea.hbm %s1505_s2, %s1240_s11  ;;  %s1535_s1 = sand.u32 1, %s1112_s20  }
  0x3e   : > { %s1534_s9 = scalar_select %p1294_p2, 1, 0 }
  0x3f   : > { %s223_s22 = scalar_lea.sflag [#allocation3], %s1535_s1  ;;  %s918_s7 = scalar_lea.hbm %s1302_s13, 128 }
  0x40   : > { %p919_p8 = scmp.ne.s32.totalorder %s1302_s13, %s918_s7  ;;  %s923_s23 = scalar_lea.hbm %s1503_s0, 256 }
  0x41   : > { %p924_p6 = scmp.lt.u32.totalorder %s1302_s13, %s1503_s0  ;;  %p925_p13 = scmp.lt.u32.totalorder %s923_s23, %s918_s7 }
  0x42   : > { %p921_p9 = pnand %p919_p8, %p1266_p4  ;;  %p927_p5 = scmp.lt.u32.totalorder %s918_s7, %s1302_s13 }
  0x43   : > { %p926_p3 = por %p925_p13, %p924_p6 }
  0x44   : > { %p922_p11 = pneg %p921_p9 }
  0x45   : > { %p928_p7 = por %p927_p5, %p926_p3 }
  0x47   : > { %p929_p10 = pnand %p928_p7, %p922_p11 }
  0x49   : > { %932 = shalt.err (!%p929_p10)
}
  0x4a   : > { %s933_s1 = scalar_lea.vmem %s1305_s15, 128  ;;  %s1127_s11 = smov [#allocation2]  }
  0x4b   : > { %p934_p12 = scmp.ne.s32.totalorder %s1305_s15, %s933_s1  ;;  %s938_s16 = sshll.u32 %s1127_s11, 4  ;;  %s939_s16 = int_to_ptr.vmem [resolvable:$false] %s938_s16 }
  0x4c   : > { %s940_s8 = scalar_lea.vmem %s939_s16, 256  ;;  %p941_p9 = scmp.lt.s32.totalorder %s1305_s15, %s939_s16 }
  0x4d   : > { %p936_p1 = pnand %p934_p12, %p1266_p4  ;;  %p942_p2 = scmp.lt.s32.totalorder %s940_s8, %s933_s1 }
  0x4f   : > { %p937_p8 = pneg %p936_p1  ;;  %p943_p6 = por %p942_p2, %p941_p9 }
  0x51   : > { %p944_p13 = pnand %p943_p6, %p937_p8 }
  0x53   : > { %947 = shalt.err (!%p944_p13)
}
  0x54   : > { %815 = dma.hbm_to_vmem [thread:$0]  (!%p1244_p0), %s1302_s13, 128, %s1305_s15, %s223_s22  }
  0x55   : > { %s263_s23 = scalar_lea.vmem [#allocation7], %s1237_s10  ;;  %s948_s27 = scalar_lea.hbm %s1311_s26, 128 }
  0x56   : > { %s270_s7 = sshll.u32 %s263_s23, 4  ;;  %p949_p11 = scmp.ne.s32.totalorder %s1311_s26, %s948_s27  ;;  %s271_s7 = int_to_ptr.vmem [resolvable:$true] %s270_s7 }
  0x57   : > { %s953_s14 = scalar_lea.hbm %s1505_s2, 256  ;;  %p954_p5 = scmp.lt.u32.totalorder %s1311_s26, %s1505_s2 }
  0x58   : > { %p951_p2 = pnand %p949_p11, %p1266_p4  ;;  %p955_p7 = scmp.lt.u32.totalorder %s953_s14, %s948_s27 }
  0x59   : > { %p957_p12 = scmp.lt.u32.totalorder %s948_s27, %s1311_s26 }
  0x5a   : > { %p952_p3 = pneg %p951_p2  ;;  %p956_p10 = por %p955_p7, %p954_p5 }
  0x5c   : > { %p958_p1 = por %p957_p12, %p956_p10 }
  0x5e   : > { %p959_p8 = pnand %p958_p1, %p952_p3 }
  0x60   : > { %962 = shalt.err (!%p959_p8)
}
  0x61   : > { %s963_s22 = scalar_lea.vmem %s271_s7, 128  ;;  %s1128_s10 = smov [#allocation7]  }
  0x62   : > { %p964_p9 = scmp.ne.s32.totalorder %s271_s7, %s963_s22  ;;  %s968_s13 = sshll.u32 %s1128_s10, 4  ;;  %s969_s13 = int_to_ptr.vmem [resolvable:$false] %s968_s13 }
  0x63   : > { %s970_s15 = scalar_lea.vmem %s969_s13, 256  ;;  %p971_p11 = scmp.lt.s32.totalorder %s271_s7, %s969_s13 }
  0x64   : > { %p966_p6 = pnand %p964_p9, %p1266_p4  ;;  %p972_p2 = scmp.lt.s32.totalorder %s970_s15, %s963_s22 }
  0x66   : > { %p967_p13 = pneg %p966_p6  ;;  %p973_p0 = por %p972_p2, %p971_p11 }
  0x68   : > { %p974_p5 = pnand %p973_p0, %p967_p13 }
  0x6a   : > { %977 = shalt.err (!%p974_p5)
}
  0x6b   : > { %p1536_p7 = scmp.ne.s32.totalorder %s1529_s12, 0  ;;  %p1537_p3 = scmp.ne.s32.totalorder %s1534_s9, 0 }
  0x6c   : > { %s1358_s25 = sand.u32 (!%p1537_p3), 1, %s1108_s19   ;;  %p1538_p0 = scmp.ne.s32.totalorder (!%p1537_p3), %s1524_s30, 0 }
  0x6d   : > { %821 = dma.hbm_to_vmem [thread:$0]  (!%p1536_p7), %s1311_s26, 128, %s271_s7, %s1260_s28  }
  0x6e   : > { %279 = sbr.rel (%p1537_p3) target bundleno = 879 (0x36f), region = 32  ;;  %s1361_s16 = sshll.u32 (!%p1537_p3), %s1358_s25, 3 }
  0x6f   : > { %s282_s8 = scalar_lea.sflag (!%p1537_p3), [#allocation3], %s1358_s25  ;;  %s285_s23 = scalar_lea.vmem (!%p1537_p3), [#allocation2], %s1361_s16 }
  0x75   : > { %1087 = dma.done.wait (%p1538_p0), %s282_s8, 128  }
  0x76   : > { %1089 = vsyncadd (%p1538_p0), %s282_s8, 4294967168  ;;  %s290_s12 = sand.u32 1, %s1195_s24   ;;  %s294_s9 = scalar_lea.vmem [#allocation5], %s1361_s16 }
  0x77   : > { %s291_s28 = scalar_lea.sflag [#allocation6], %s290_s12 }
  0x78   : > { %1091 = dma.done.wait (%p1538_p0), %s291_s28, 256  }
  0x79   : > { %1093 = vsyncadd (%p1538_p0), %s291_s28, 4294967040  ;;  %v1129_v0 = vmov 0.0   ;;  %vm1130_vm0 = vmmov 0   ;;  %vm354_vm1 = vcmask 261120   ;;  %v352_v1 = vld [vmem:[%s294_s9] sm:$0xff]  ;;  %v350_v2 = vld [vmem:[%s285_s23] sm:$0xff] }
  0x7a   : > { %790 = vmatprep.subr.mxu0 %v1129_v0  ;;  %792 = vmatprep.mubr.msk.f32.mxu0 %vm1130_vm0, %v1129_v0  ;;  %v351_v3 = vmul.f32 0.17677669, %v350_v2  ;;  %vm431_vm2 = vcmask 64512   ;;  %s342_s30 = scalar_lea.vmem [#allocation9], %s1361_s16  ;;  %s303_s26 = scalar_lea.vmem [#allocation7], %s1361_s16 }
  0x7b   : > { %795 = vmatprep.subr.mxu1 %v1129_v0  ;;  %797 = vmatprep.mubr.msk.f32.mxu1 %vm1130_vm0, %v1129_v0  ;;  %v353_v12 = vld [vmem:[%s303_s26] sm:$0xff]  ;;  %s349_s7 = scalar_lea.vmem [#allocation11], %s1361_s16  ;;  %s1390_s27 = sshll.u32 %s1116_s21, 7 }
  0x7c   : > { %791 = vmatpush3.xpose.msk.msra.mxu0 %vm354_vm1, %v352_v1  ;;  %796 = vmatpush3.msra.mxu1 %v353_v12  ;;  %s558_s29 = sshll.u32 %s342_s30, 4  ;;  %s1396_s1 = scalar_lea.hbm %s1507_s4, %s1390_s27  ;;  %s559_s29 = int_to_ptr.vmem [resolvable:$true] %s558_s29 }
  0x7d   : > { %s1400_s11 = scalar_lea.sflag [#allocation10], %s290_s12  ;;  %s978_s22 = scalar_lea.vmem %s559_s29, 128 }
  0x7e   : > { %p979_p4 = scmp.ne.s32.totalorder %s559_s29, %s978_s22  ;;  %p1539_p10 = scmp.ne.s32.totalorder %s1525_s6, 0 }
  0x7f   : > { %793 = vmatmul.mubr.msk.f32.vlgmr.msra.gmra.mrb[0].mxu0 %vm354_vm1, %v351_v3  ;;  %s1131_s10 = smov [#allocation9]  }
  0x80   : > { %p980_p12 = pnand %p979_p4, %p1539_p10  ;;  %s982_s13 = sshll.u32 %s1131_s10, 4  ;;  %s983_s13 = int_to_ptr.vmem [resolvable:$false] %s982_s13 }
  0x81   : > { %s984_s21 = scalar_lea.vmem %s983_s13, 256  ;;  %p985_p8 = scmp.lt.s32.totalorder %s559_s29, %s983_s13 }
  0x82   : > { %p981_p1 = pneg %p980_p12  ;;  %p986_p9 = scmp.lt.s32.totalorder %s984_s21, %s978_s22 }
  0x84   : > { %p987_p6 = por %p986_p9, %p985_p8 }
  0x86   : > { %p988_p13 = pnand %p987_p6, %p981_p1 }
 0x152   : > { %v427_v4 = vpop.f32.mrb[0].mxu0 }
 0x153   : > { %432 = vst.msk [vmem:[%s342_s30] sm:$0xff] %vm431_vm2, %v427_v4  ;;  %v794_v5 = vpop.f32.mrb[1].mxu0  ;;  %v433_v6 = vsel %vm431_vm2, %v427_v4, -inf }
 0x154   : > { %434 = vmax.xlane.f32.xlu0 %v433_v6 }
 0x1e1   : > { %v435_v7 = vpop.xlane.xlu0 %434 }
 0x1e2   : > { %v436_v8 = vsub.f32 %v427_v4, %v435_v7 }
 0x1e4   : > { %v437_v9 = vmul.f32 1.442695, %v436_v8 }
 0x1e6   : > { %884 = vpow2.f32 %v437_v9 }
 0x1f0   : > { %v885_v10 = vpop.eup %884 }
 0x1f1   : > { %v439_v11 = vsel %vm431_vm2, %v885_v10, 0.0 }
 0x1f2   : > { %440 = vadd.xlane.f32.xlu0 %v439_v11 }
 0x27f   : > { %v441_v13 = vpop.xlane.xlu0 %440 }
 0x280   : > { %886 = vrcp.f32 %v441_v13 }
 0x28a   : > { %v887_v14 = vpop.eup %886 }
 0x28b   : > { %v443_v15 = vmul.f32 %v887_v14, %v885_v10 }
 0x28d   : > { %798 = vmatmul.mubr.msk.f32.vlgmr.msra.gmra.mrb[0].mxu1 %vm431_vm2, %v443_v15  ;;  %444 = vst.msk [vmem:[%s349_s7] sm:$0xff] %vm431_vm2, %v443_v15 }
 0x28e   : > { %991 = shalt.err (!%p988_p13)
}
 0x28f   : > { %s992_s24 = scalar_lea.hbm %s1396_s1, 128  ;;  %s996_s23 = scalar_lea.hbm %s1507_s4, 256 }
 0x290   : > { %p993_p11 = scmp.ne.s32.totalorder %s1396_s1, %s992_s24  ;;  %p997_p7 = scmp.lt.u32.totalorder %s1396_s1, %s1507_s4 }
 0x291   : > { %p998_p3 = scmp.lt.u32.totalorder %s996_s23, %s992_s24  ;;  %p1000_p4 = scmp.lt.u32.totalorder %s992_s24, %s1396_s1 }
 0x292   : > { %p994_p2 = pnand %p993_p11, %p1539_p10 }
 0x293   : > { %p999_p0 = por %p998_p3, %p997_p7 }
 0x294   : > { %p995_p5 = pneg %p994_p2 }
 0x295   : > { %p1001_p12 = por %p1000_p4, %p999_p0 }
 0x297   : > { %p1002_p1 = pnand %p1001_p12, %p995_p5 }
 0x299   : > { %1005 = shalt.err (!%p1002_p1)
}
 0x29a   : > { %807 = dma.vmem_to_hbm [thread:$0]  (%p1539_p10), %s559_s29, 128, %s1396_s1, %s1400_s11  }
 0x29b   : > { %s1424_s26 = scalar_lea.hbm %s1508_s5, %s1390_s27  ;;  %s572_s17 = sshll.u32 %s349_s7, 4  ;;  %s573_s17 = int_to_ptr.vmem [resolvable:$true] %s572_s17 }
 0x29c   : > { %s1006_s14 = scalar_lea.vmem %s573_s17, 128  ;;  %s1132_s22 = smov [#allocation11]  }
 0x29d   : > { %p1007_p8 = scmp.ne.s32.totalorder %s573_s17, %s1006_s14  ;;  %s1010_s10 = sshll.u32 %s1132_s22, 4  ;;  %s1011_s10 = int_to_ptr.vmem [resolvable:$false] %s1010_s10 }
 0x29e   : > { %s1012_s13 = scalar_lea.vmem %s1011_s10, 256  ;;  %p1013_p13 = scmp.lt.s32.totalorder %s573_s17, %s1011_s10 }
 0x29f   : > { %p1008_p9 = pnand %p1007_p8, %p1539_p10  ;;  %p1014_p11 = scmp.lt.s32.totalorder %s1012_s13, %s1006_s14 }
 0x2a1   : > { %p1009_p6 = pneg %p1008_p9  ;;  %p1015_p2 = por %p1014_p11, %p1013_p13 }
 0x2a3   : > { %p1016_p5 = pnand %p1015_p2, %p1009_p6 }
 0x2a5   : > { %1019 = shalt.err (!%p1016_p5)
}
 0x2a6   : > { %s1020_s7 = scalar_lea.hbm %s1424_s26, 128  ;;  %s1024_s21 = scalar_lea.hbm %s1508_s5, 256 }
 0x2a7   : > { %p1021_p7 = scmp.ne.s32.totalorder %s1424_s26, %s1020_s7  ;;  %p1025_p4 = scmp.lt.u32.totalorder %s1424_s26, %s1508_s5 }
 0x2a8   : > { %p1026_p12 = scmp.lt.u32.totalorder %s1024_s21, %s1020_s7  ;;  %p1028_p8 = scmp.lt.u32.totalorder %s1020_s7, %s1424_s26 }
 0x2a9   : > { %p1022_p3 = pnand %p1021_p7, %p1539_p10 }
 0x2aa   : > { %p1027_p1 = por %p1026_p12, %p1025_p4 }
 0x2ab   : > { %p1023_p0 = pneg %p1022_p3 }
 0x2ac   : > { %p1029_p9 = por %p1028_p8, %p1027_p1 }
 0x2ae   : > { %p1030_p6 = pnand %p1029_p9, %p1023_p0 }
 0x2b0   : > { %1033 = shalt.err (!%p1030_p6)
}
 0x2b1   : > { %808 = dma.vmem_to_hbm [thread:$0]  (%p1539_p10), %s573_s17, 128, %s1424_s26, %s1400_s11  }
 0x2b2   : > { %s335_s8 = scalar_lea.vmem [#allocation8], %s1361_s16  ;;  %s1451_s9 = scalar_lea.hbm %s1506_s3, %s1390_s27 }
 0x2b3   : > { %s544_s23 = sshll.u32 %s335_s8, 4  ;;  %s520_s30 = scalar_lea.sflag [#allocation4], %s1358_s25  ;;  %s1453_s23 = int_to_ptr.vmem [resolvable:$true] %s544_s23 }
 0x2b4   : > { %s1034_s14 = scalar_lea.vmem %s1453_s23, 128  ;;  %s1133_s16 = smov [#allocation8]  }
 0x2b5   : > { %p1035_p13 = scmp.ne.s32.totalorder %s1453_s23, %s1034_s14  ;;  %s1038_s11 = sshll.u32 %s1133_s16, 4  ;;  %s1039_s11 = int_to_ptr.vmem [resolvable:$false] %s1038_s11 }
 0x2b6   : > { %s1040_s27 = scalar_lea.vmem %s1039_s11, 256  ;;  %p1041_p5 = scmp.lt.s32.totalorder %s1453_s23, %s1039_s11 }
 0x2b7   : > { %p1036_p11 = pnand %p1035_p13, %p1539_p10  ;;  %p1042_p7 = scmp.lt.s32.totalorder %s1040_s27, %s1034_s14 }
 0x2b9   : > { %p1037_p2 = pneg %p1036_p11  ;;  %p1043_p3 = por %p1042_p7, %p1041_p5 }
 0x2bb   : > { %p1044_p0 = pnand %p1043_p3, %p1037_p2 }
 0x360   : > { %v514_v16 = vpop.f32.mrb[0].mxu1 }
 0x361   : > { %518 = vst.msk [vmem:[%s335_s8] sm:$0xff] %vm354_vm1, %v514_v16  ;;  %v799_v17 = vpop.f32.mrb[1].mxu1 }
 0x362   : > { %1047 = shalt.err (!%p1044_p0)
}
 0x363   : > { %s1048_s25 = scalar_lea.hbm %s1451_s9, 128  ;;  %s1052_s22 = scalar_lea.hbm %s1506_s3, 256 }
 0x364   : > { %p1049_p4 = scmp.ne.s32.totalorder %s1451_s9, %s1048_s25  ;;  %p1053_p8 = scmp.lt.u32.totalorder %s1451_s9, %s1506_s3 }
 0x365   : > { %p1054_p9 = scmp.lt.u32.totalorder %s1052_s22, %s1048_s25  ;;  %p1056_p13 = scmp.lt.u32.totalorder %s1048_s25, %s1451_s9 }
 0x366   : > { %p1050_p12 = pnand %p1049_p4, %p1539_p10 }
 0x367   : > { %p1055_p6 = por %p1054_p9, %p1053_p8 }
 0x368   : > { %p1051_p1 = pneg %p1050_p12 }
 0x369   : > { %p1057_p11 = por %p1056_p13, %p1055_p6 }
 0x36b   : > { %p1058_p2 = pnand %p1057_p11, %p1051_p1 }
 0x36d   : > { %1061 = shalt.err (!%p1058_p2)
}
 0x36e   : > { %806 = dma.vmem_to_hbm [thread:$0]  (%p1539_p10), %s1453_s23, 128, %s1451_s9, %s520_s30  }
 0x36f PF: > { %s1540_s7 = sld [smem:[#allocation20_spill]]  ;;  %s1541_s29 = sld [smem:[#allocation17_spill]] }
 0x370   : > { %s584_s1 = sand.u32 1, %s1104_s18  }
 0x371   : > { %s585_s21 = scalar_lea.sflag [#allocation4], %s584_s1 }
 0x375   : > { %p1542_p5 = scmp.ne.s32.totalorder %s1540_s7, 0  ;;  %p1543_p7 = scmp.ge.s32.totalorder %s1541_s29, 2 }
 0x377   : > { %p823_p3 = pnand %p1543_p7, %p1542_p5 }
 0x379   : > { %1095 = dma.done.wait (!%p823_p3), %s585_s21, 128  }
 0x37a   : > { %1097 = vsyncadd (!%p823_p3), %s585_s21, 4294967168  ;;  %s1544_s24 = sadd.s32 4294967294, %s1541_s29  }
 0x37b   : > { %s593_s15 = sand.u32 1, %s1544_s24  }
 0x37c   : > { %s594_s8 = scalar_lea.sflag [#allocation10], %s593_s15 }
 0x37d   : > { %1099 = dma.done.wait (!%p823_p3), %s594_s8, 256  }
 0x37e   : > { %1101 = vsyncadd (!%p823_p3), %s594_s8, 4294967040  ;;  %s28_s23 = sadd.s32 1, %s1541_s29   ;;  %s1545_s6 = sld [smem:[#allocation19_spill]] }
 0x37f   : > { %p25_p10 = scmp.ge.s32.totalorder %s28_s23, 4   ;;  %s1546_s21 = sld [smem:[#allocation16_spill]] }
 0x380   : > { %s1547_s22 = sld [smem:[#allocation18_spill]]  ;;  %s1548_s18 = smov %s1108_s19 }
 0x381   : > { %s1549_s19 = smov %s1112_s20  ;;  %27 = sbr.rel (!%p25_p10) target bundleno = 12 (0xc), region = 133 }
 0x384   : > { %s1550_s20 = smov %s1545_s6 }
 0x388   :  { %608 = vsyncpa [#allocation3], 1 }
 0x389   :  { %610 = vsyncpa [#allocation3 + $0x1], 1 }
 0x38a   :  { %611 = vsyncpa [#allocation6], 1 }
 0x38b   :  { %613 = vsyncpa [#allocation6 + $0x1], 1 }
 0x38c   :  { %614 = vsyncpa [#allocation4], 1 }
 0x38d   :  { %616 = vsyncpa [#allocation4 + $0x1], 1 }
 0x38e   :  { %617 = vsyncpa [#allocation10], 1 }
 0x38f   :  { %619 = vsyncpa [#allocation10 + $0x1], 1 }

</bundles_post_ra>
